<compile_context>
chip_gen: v5e
topology: v5e:2x2
jax: 0.10.0
libtpu: 0.0.40
codegen_flags: <defaults>
</compile_context>

<pallas_src>
import functools
import math

import jax
import jax.numpy as jnp
from jax.experimental import pallas as pl
from jax.experimental.pallas import tpu as pltpu

_NEG_INF = -1e30  # masks padded atom lanes out of the softmax (exp -> exactly 0)


def rainbow_kernel(x_ref, w1_ref, b1_ref, w2_ref, b2_ref, wva_ref, bva_ref,
                   out_ref, *, num_actions, n_pad):
    """One batch tile of the Rainbow forward.

    x:   (TB, S)
    w1:  (S, 64),   b1: (1, 64)
    w2:  (64, 64),  b2: (1, 64)
    wva: (64, (A+1)*n_pad)  column blocks = [adv_0 | ... | adv_{A-1} | value_folded]
    bva: (1, (A+1)*n_pad)   value_folded pad atoms hold -1e30, adv pads hold 0
    out: (TB, A*n_pad)
    """
    x = x_ref[...]

    h1 = jnp.dot(x, w1_ref[...], preferred_element_type=jnp.float32) + b1_ref[...]
    h1 = jnp.maximum(h1, 0.0)

    h2 = jnp.dot(h1, w2_ref[...], preferred_element_type=jnp.float32) + b2_ref[...]
    h2 = jnp.maximum(h2, 0.0)

    # Single fused matmul: all advantage streams + the (value - adv_mean) block.
    fused = jnp.dot(h2, wva_ref[...], preferred_element_type=jnp.float32) + bva_ref[...]

    wide = num_actions * n_pad
    adv = fused[:, :wide]              # lane-aligned slab (offset 0)
    vfold = fused[:, wide:]            # (TB, n_pad), offset = multiple of 128

    # logits_a = value + (adv_a - adv_mean); the fold is already in vfold.
    logits = adv + jnp.concatenate([vfold] * num_actions, axis=-1)   # (TB, A*n_pad)

    # One row-wide max (shared across actions -> cancels in each per-action softmax)
    # and ONE wide exp over the whole slab.  Pad lanes (-1e30) underflow to 0.
    m = jnp.max(logits, axis=-1, keepdims=True)
    e = jnp.exp(logits - m)

    # Per-action 64-lane sums + exact reciprocal normalize; single wide store.
    parts = []
    for a in range(num_actions):
        blk = e[:, a * n_pad:(a + 1) * n_pad]
        s = jnp.sum(blk, axis=-1, keepdims=True)
        parts.append(blk * pl.reciprocal(s, approx=False))
    out_ref[...] = jnp.concatenate(parts, axis=-1)                   # (TB, A*n_pad)


def _round_up(v, m):
    return ((v + m - 1) // m) * m


def _resident_spec(shape):
    """Full-array block that stays resident across the batch grid."""
    nd = len(shape)
    return pl.BlockSpec(shape, lambda i, _nd=nd: (0,) * _nd)


def rainbow_forward(x, params, *, action_dim, num_atoms, n_pad=64,
                    tile_batch=1024, drop_atom_padding=False):
    """x: (batch, state_dim) float32.

    Returns (batch, action_dim, n_pad) by default — pad atoms carry exactly 0
    probability, so downstream sum(p*z) / projection ops are unaffected and the
    expensive last-dim slice copy is avoided.  Pass drop_atom_padding=True to get
    the exact (batch, action_dim, num_atoms) module output.
    """
    w1, b1, w2, b2, wva, bva = (params[k] for k in
                                ("w1", "b1", "w2", "b2", "wva", "bva"))
    batch, state_dim = x.shape
    hidden = w1.shape[1]
    out_cols = action_dim * n_pad

    # Batch tile: multiple of 8 sublanes, capped at tile_batch, and capped at
    # ceil(batch/2) so moderate batches still give >=2 grid steps (v7x megacore).
    tb_half = _round_up(pl.cdiv(batch, 2), 8)
    tb = max(8, min(_round_up(tile_batch, 8), tb_half))
    batch_p = _round_up(batch, tb)
    if batch_p != batch:
        x = jnp.pad(x, ((0, batch_p - batch), (0, 0)))

    grid = (batch_p // tb,)

    flops = 2 * batch_p * (state_dim * hidden + hidden * hidden
                           + hidden * wva.shape[1])
    bytes_accessed = 4 * (x.size + w1.size + b1.size + w2.size + b2.size
                          + wva.size + bva.size + batch_p * out_cols)

    out = pl.pallas_call(
        functools.partial(rainbow_kernel, num_actions=action_dim, n_pad=n_pad),
        out_shape=jax.ShapeDtypeStruct((batch_p, out_cols), jnp.float32),
        grid=grid,
        in_specs=[pl.BlockSpec((tb, state_dim), lambda i: (i, 0)),
                  _resident_spec(w1.shape), _resident_spec(b1.shape),
                  _resident_spec(w2.shape), _resident_spec(b2.shape),
                  _resident_spec(wva.shape), _resident_spec(bva.shape)],
        out_specs=pl.BlockSpec((tb, out_cols), lambda i: (i, 0)),
        compiler_params=pltpu.CompilerParams(
            dimension_semantics=("parallel",)),
        cost_estimate=pl.CostEstimate(
            flops=flops,
            transcendentals=batch_p * out_cols,
            bytes_accessed=bytes_accessed),
    )(x, w1, b1, w2, b2, wva, bva)

    out = out[:batch].reshape(batch, action_dim, n_pad)   # free reshape
    if drop_atom_padding:
        out = out[:, :, :num_atoms]                        # optional (copies)
    return out


def init_noisy_linear(key, in_features, out_features, sigma_init=0.017):
    """Deterministic NoisyLinear params, folded: W_eff = mu + sigma * eps."""
    k_wmu, k_weps, k_bmu, k_beps = jax.random.split(key, 4)
    bound = math.sqrt(3.0 / in_features)
    w_mu = jax.random.uniform(k_wmu, (out_features, in_features),
                              minval=-bound, maxval=bound, dtype=jnp.float32)
    b_mu = jax.random.uniform(k_bmu, (out_features,),
                              minval=-bound, maxval=bound, dtype=jnp.float32)
    w_eps = jax.random.normal(k_weps, (out_features, in_features), dtype=jnp.float32)
    b_eps = jax.random.normal(k_beps, (out_features,), dtype=jnp.float32)
    return w_mu + sigma_init * w_eps, b_mu + sigma_init * b_eps


def make_params(key, state_dim, action_dim, num_atoms=51, sigma_init=0.017, n_pad=64):
    assert n_pad >= num_atoms
    hidden = 64
    k1, k2, k3, k4 = jax.random.split(key, 4)
    w1, b1 = init_noisy_linear(k1, state_dim, hidden, sigma_init)
    w2, b2 = init_noisy_linear(k2, hidden, hidden, sigma_init)
    wv, bv = init_noisy_linear(k3, hidden, num_atoms, sigma_init)
    wa, ba = init_noisy_linear(k4, hidden, action_dim * num_atoms, sigma_init)

    # (in, out) layouts so the kernel computes x @ W with no transposes.
    w1_t, w2_t, wv_t, wa_t = w1.T, w2.T, wv.T, wa.T          # wa_t: (64, A*num_atoms)

    # Fold the dueling combine into the value block: value_folded = value - adv_mean.
    wa3 = wa_t.reshape(hidden, action_dim, num_atoms)
    ba2 = ba.reshape(action_dim, num_atoms)
    wv_fold = wv_t - jnp.mean(wa3, axis=1)                   # (64, num_atoms)
    bv_fold = bv - jnp.mean(ba2, axis=0)                     # (num_atoms,)

    pad = n_pad - num_atoms
    # Advantage blocks: pad atom columns with 0 (weights AND bias) -> pad atoms
    # contribute nothing and the -1e30 value-bias mask stays exact.
    wa_p = jnp.pad(wa3, ((0, 0), (0, 0), (0, pad))).reshape(hidden, action_dim * n_pad)
    ba_p = jnp.pad(ba2, ((0, 0), (0, pad))).reshape(action_dim * n_pad)
    # Folded value block: pad weight columns with 0, pad bias with -1e30.
    wv_p = jnp.pad(wv_fold, ((0, 0), (0, pad)))                            # (64, n_pad)
    bv_p = jnp.pad(bv_fold, ((0, pad),), constant_values=_NEG_INF)         # (n_pad,)

    # Layout = [adv_0 | ... | adv_{A-1} | value_folded] so both wide slices in the
    # kernel start on lane offsets that are multiples of 128.
    wva = jnp.concatenate([wa_p, wv_p], axis=1)              # (64, (A+1)*n_pad)
    bva = jnp.concatenate([ba_p, bv_p])[None, :]             # (1, (A+1)*n_pad)

    return {
        # kernel (fused, folded, padded) params
        "w1": w1_t, "b1": b1[None, :],
        "w2": w2_t, "b2": b2[None, :],
        "wva": wva, "bva": bva,
        # un-padded per-stream params for the pure-JAX reference
        "wv": wv_t, "bv": bv[None, :],
        "wa": wa_t, "ba": ba[None, :],
    }


def rainbow_reference(x, params, action_dim, num_atoms):
    """Pure-JAX reference mirroring the PyTorch forward exactly."""
    h1 = jax.nn.relu(x @ params["w1"] + params["b1"])
    h2 = jax.nn.relu(h1 @ params["w2"] + params["b2"])
    value = (h2 @ params["wv"] + params["bv"]).reshape(-1, 1, num_atoms)
    adv = (h2 @ params["wa"] + params["ba"]).reshape(-1, action_dim, num_atoms)
    adv_mean = jnp.mean(adv, axis=1, keepdims=True)
    q = value + (adv - adv_mean)
    return jax.nn.softmax(q, axis=2)


if __name__ == "__main__":
    state_dim, action_dim, num_atoms, n_pad = 8, 4, 51, 64
    batch = 2

    key = jax.random.PRNGKey(0)
    k_params, k_x = jax.random.split(key)
    params = make_params(k_params, state_dim, action_dim, num_atoms, n_pad=n_pad)
    x = jax.random.normal(k_x, (batch, state_dim), dtype=jnp.float32)

    # Default (performance) path: padded atoms, zero probability on pad lanes.
    q_pad = rainbow_forward(x, params, action_dim=action_dim,
                            num_atoms=num_atoms, n_pad=n_pad)
    q_pad = jax.block_until_ready(q_pad)

    ref = rainbow_reference(x, params, action_dim, num_atoms)
    assert q_pad.shape == (batch, action_dim, n_pad), q_pad.shape
    # Pad atoms carry exactly zero probability and rows still sum to 1.
    assert jnp.all(q_pad[:, :, num_atoms:] == 0.0)
    assert jnp.allclose(jnp.sum(q_pad, axis=-1), 1.0, atol=1e-5)
    assert jnp.allclose(q_pad[:, :, :num_atoms], ref, atol=1e-5, rtol=1e-5)

    # Exact module-shaped output also available.
    q_exact = rainbow_forward(x, params, action_dim=action_dim,
                              num_atoms=num_atoms, n_pad=n_pad,
                              drop_atom_padding=True)
    q_exact = jax.block_until_ready(q_exact)
    assert q_exact.shape == (batch, action_dim, num_atoms), q_exact.shape
    assert jnp.allclose(q_exact, ref, atol=1e-5, rtol=1e-5)

    print("KERNEL_OK")
</pallas_src>

<mosaic_0001>
module attributes {stable_mosaic.version = 11 : i64} {
  func.func @rainbow_kernel(%arg0: i32, %arg1: memref<8x8xf32, #tpu.memory_space<vmem>>, %arg2: memref<8x64xf32, #tpu.memory_space<vmem>>, %arg3: memref<1x64xf32, #tpu.memory_space<vmem>>, %arg4: memref<64x64xf32, #tpu.memory_space<vmem>>, %arg5: memref<1x64xf32, #tpu.memory_space<vmem>>, %arg6: memref<64x320xf32, #tpu.memory_space<vmem>>, %arg7: memref<1x320xf32, #tpu.memory_space<vmem>>, %arg8: memref<8x256xf32, #tpu.memory_space<vmem>>) attributes {dimension_semantics = [#tpu.dimension_semantics<parallel>], iteration_bounds = array<i64: 1>, scalar_prefetch = 0 : i64, scratch_operands = 0 : i64, tpu.core_type = #tpu.core_type<tc>, window_params = [{transform_indices = @transform_0, window_bounds = array<i64: 8, 8>}, {pipeline_mode = #tpu.pipeline_mode<synchronous>, transform_indices = @transform_1, window_bounds = array<i64: 8, 64>}, {pipeline_mode = #tpu.pipeline_mode<synchronous>, transform_indices = @transform_2, window_bounds = array<i64: 1, 64>}, {pipeline_mode = #tpu.pipeline_mode<synchronous>, transform_indices = @transform_3, window_bounds = array<i64: 64, 64>}, {pipeline_mode = #tpu.pipeline_mode<synchronous>, transform_indices = @transform_4, window_bounds = array<i64: 1, 64>}, {pipeline_mode = #tpu.pipeline_mode<synchronous>, transform_indices = @transform_5, window_bounds = array<i64: 64, 320>}, {pipeline_mode = #tpu.pipeline_mode<synchronous>, transform_indices = @transform_6, window_bounds = array<i64: 1, 320>}, {transform_indices = @transform_7, window_bounds = array<i64: 8, 256>}]} {
    %c0 = arith.constant 0 : index
    %c0_0 = arith.constant 0 : index
    %0 = vector.load %arg1[%c0, %c0_0] : memref<8x8xf32, #tpu.memory_space<vmem>>, vector<8x8xf32>
    %c0_1 = arith.constant 0 : index
    %c0_2 = arith.constant 0 : index
    %1 = vector.load %arg2[%c0_1, %c0_2] : memref<8x64xf32, #tpu.memory_space<vmem>>, vector<8x64xf32>
    %cst = arith.constant dense<0.000000e+00> : vector<8x64xf32>
    %2 = tpu.matmul %0, %1, %cst {dimension_numbers = #tpu.dot_dimension_numbers<[1], [0], [0], [1], [0, 0, 1, 1], [], []>} : vector<8x8xf32>, vector<8x64xf32>, vector<8x64xf32> -> vector<8x64xf32>
    %c0_3 = arith.constant 0 : index
    %c0_4 = arith.constant 0 : index
    %3 = vector.load %arg3[%c0_3, %c0_4] : memref<1x64xf32, #tpu.memory_space<vmem>>, vector<1x64xf32>
    %4 = vector.broadcast %3 : vector<1x64xf32> to vector<8x64xf32>
    %5 = arith.addf %2, %4 : vector<8x64xf32>
    %cst_5 = arith.constant 0.000000e+00 : f32
    %6 = vector.broadcast %cst_5 : f32 to vector<8x64xf32>
    %7 = arith.maximumf %5, %6 : vector<8x64xf32>
    %c0_6 = arith.constant 0 : index
    %c0_7 = arith.constant 0 : index
    %8 = vector.load %arg4[%c0_6, %c0_7] : memref<64x64xf32, #tpu.memory_space<vmem>>, vector<64x64xf32>
    %cst_8 = arith.constant dense<0.000000e+00> : vector<8x64xf32>
    %9 = tpu.matmul %7, %8, %cst_8 {dimension_numbers = #tpu.dot_dimension_numbers<[1], [0], [0], [1], [0, 0, 1, 1], [], []>} : vector<8x64xf32>, vector<64x64xf32>, vector<8x64xf32> -> vector<8x64xf32>
    %c0_9 = arith.constant 0 : index
    %c0_10 = arith.constant 0 : index
    %10 = vector.load %arg5[%c0_9, %c0_10] : memref<1x64xf32, #tpu.memory_space<vmem>>, vector<1x64xf32>
    %11 = vector.broadcast %10 : vector<1x64xf32> to vector<8x64xf32>
    %12 = arith.addf %9, %11 : vector<8x64xf32>
    %cst_11 = arith.constant 0.000000e+00 : f32
    %13 = vector.broadcast %cst_11 : f32 to vector<8x64xf32>
    %14 = arith.maximumf %12, %13 : vector<8x64xf32>
    %c0_12 = arith.constant 0 : index
    %c0_13 = arith.constant 0 : index
    %15 = vector.load %arg6[%c0_12, %c0_13] : memref<64x320xf32, #tpu.memory_space<vmem>>, vector<64x320xf32>
    %cst_14 = arith.constant dense<0.000000e+00> : vector<8x320xf32>
    %16 = tpu.matmul %14, %15, %cst_14 {dimension_numbers = #tpu.dot_dimension_numbers<[1], [0], [0], [1], [0, 0, 1, 1], [], []>} : vector<8x64xf32>, vector<64x320xf32>, vector<8x320xf32> -> vector<8x320xf32>
    %c0_15 = arith.constant 0 : index
    %c0_16 = arith.constant 0 : index
    %17 = vector.load %arg7[%c0_15, %c0_16] : memref<1x320xf32, #tpu.memory_space<vmem>>, vector<1x320xf32>
    %18 = vector.broadcast %17 : vector<1x320xf32> to vector<8x320xf32>
    %19 = arith.addf %16, %18 : vector<8x320xf32>
    %20 = vector.extract_strided_slice %19 {offsets = [0, 0], sizes = [8, 256], strides = [1, 1]} : vector<8x320xf32> to vector<8x256xf32>
    %21 = vector.extract_strided_slice %19 {offsets = [0, 256], sizes = [8, 64], strides = [1, 1]} : vector<8x320xf32> to vector<8x64xf32>
    %22 = tpu.concatenate %21, %21, %21, %21 in 1 : vector<8x64xf32>, vector<8x64xf32>, vector<8x64xf32>, vector<8x64xf32> -> vector<8x256xf32>
    %23 = arith.addf %20, %22 : vector<8x256xf32>
    %cst_17 = arith.constant dense<0xFF800000> : vector<8xf32>
    %24 = vector.multi_reduction <maximumf>, %23, %cst_17 [1] : vector<8x256xf32> to vector<8xf32>
    %25 = vector.shape_cast %24 : vector<8xf32> to vector<8x1xf32>
    %26 = vector.broadcast %25 : vector<8x1xf32> to vector<8x256xf32>
    %27 = arith.subf %23, %26 : vector<8x256xf32>
    %28 = math.exp %27 : vector<8x256xf32>
    %29 = vector.extract_strided_slice %28 {offsets = [0, 0], sizes = [8, 64], strides = [1, 1]} : vector<8x256xf32> to vector<8x64xf32>
    %cst_18 = arith.constant dense<0.000000e+00> : vector<8xf32>
    %30 = vector.multi_reduction <add>, %29, %cst_18 [1] : vector<8x64xf32> to vector<8xf32>
    %31 = vector.shape_cast %30 : vector<8xf32> to vector<8x1xf32>
    %32 = tpu.reciprocal %31 : vector<8x1xf32> -> vector<8x1xf32>
    %33 = vector.broadcast %32 : vector<8x1xf32> to vector<8x64xf32>
    %34 = arith.mulf %29, %33 : vector<8x64xf32>
    %35 = vector.extract_strided_slice %28 {offsets = [0, 64], sizes = [8, 64], strides = [1, 1]} : vector<8x256xf32> to vector<8x64xf32>
    %cst_19 = arith.constant dense<0.000000e+00> : vector<8xf32>
    %36 = vector.multi_reduction <add>, %35, %cst_19 [1] : vector<8x64xf32> to vector<8xf32>
    %37 = vector.shape_cast %36 : vector<8xf32> to vector<8x1xf32>
    %38 = tpu.reciprocal %37 : vector<8x1xf32> -> vector<8x1xf32>
    %39 = vector.broadcast %38 : vector<8x1xf32> to vector<8x64xf32>
    %40 = arith.mulf %35, %39 : vector<8x64xf32>
    %41 = vector.extract_strided_slice %28 {offsets = [0, 128], sizes = [8, 64], strides = [1, 1]} : vector<8x256xf32> to vector<8x64xf32>
    %cst_20 = arith.constant dense<0.000000e+00> : vector<8xf32>
    %42 = vector.multi_reduction <add>, %41, %cst_20 [1] : vector<8x64xf32> to vector<8xf32>
    %43 = vector.shape_cast %42 : vector<8xf32> to vector<8x1xf32>
    %44 = tpu.reciprocal %43 : vector<8x1xf32> -> vector<8x1xf32>
    %45 = vector.broadcast %44 : vector<8x1xf32> to vector<8x64xf32>
    %46 = arith.mulf %41, %45 : vector<8x64xf32>
    %47 = vector.extract_strided_slice %28 {offsets = [0, 192], sizes = [8, 64], strides = [1, 1]} : vector<8x256xf32> to vector<8x64xf32>
    %cst_21 = arith.constant dense<0.000000e+00> : vector<8xf32>
    %48 = vector.multi_reduction <add>, %47, %cst_21 [1] : vector<8x64xf32> to vector<8xf32>
    %49 = vector.shape_cast %48 : vector<8xf32> to vector<8x1xf32>
    %50 = tpu.reciprocal %49 : vector<8x1xf32> -> vector<8x1xf32>
    %51 = vector.broadcast %50 : vector<8x1xf32> to vector<8x64xf32>
    %52 = arith.mulf %47, %51 : vector<8x64xf32>
    %53 = tpu.concatenate %34, %40, %46, %52 in 1 : vector<8x64xf32>, vector<8x64xf32>, vector<8x64xf32>, vector<8x64xf32> -> vector<8x256xf32>
    %c0_22 = arith.constant 0 : index
    %c0_23 = arith.constant 0 : index
    %54 = vector.load %arg8[%c0_22, %c0_23] : memref<8x256xf32, #tpu.memory_space<vmem>>, vector<8x256xf32>
    tpu.vector_store %arg8[%c0_22, %c0_23], %53 {strides = array<i32>} : memref<8x256xf32, #tpu.memory_space<vmem>>, vector<8x256xf32>,
    return
  }
  func.func @transform_0(%arg0: i32) -> (i32, i32) {
    %c0_i32 = arith.constant 0 : i32
    %c0_i32_0 = arith.constant 0 : i32
    return %arg0, %c0_i32 : i32, i32
  }
  func.func @transform_1(%arg0: i32) -> (i32, i32) {
    %c0_i32 = arith.constant 0 : i32
    %c0_i32_0 = arith.constant 0 : i32
    %c0_i32_1 = arith.constant 0 : i32
    return %c0_i32, %c0_i32_0 : i32, i32
  }
  func.func @transform_2(%arg0: i32) -> (i32, i32) {
    %c0_i32 = arith.constant 0 : i32
    %c0_i32_0 = arith.constant 0 : i32
    %c0_i32_1 = arith.constant 0 : i32
    return %c0_i32, %c0_i32_0 : i32, i32
  }
  func.func @transform_3(%arg0: i32) -> (i32, i32) {
    %c0_i32 = arith.constant 0 : i32
    %c0_i32_0 = arith.constant 0 : i32
    %c0_i32_1 = arith.constant 0 : i32
    return %c0_i32, %c0_i32_0 : i32, i32
  }
  func.func @transform_4(%arg0: i32) -> (i32, i32) {
    %c0_i32 = arith.constant 0 : i32
    %c0_i32_0 = arith.constant 0 : i32
    %c0_i32_1 = arith.constant 0 : i32
    return %c0_i32, %c0_i32_0 : i32, i32
  }
  func.func @transform_5(%arg0: i32) -> (i32, i32) {
    %c0_i32 = arith.constant 0 : i32
    %c0_i32_0 = arith.constant 0 : i32
    %c0_i32_1 = arith.constant 0 : i32
    return %c0_i32, %c0_i32_0 : i32, i32
  }
  func.func @transform_6(%arg0: i32) -> (i32, i32) {
    %c0_i32 = arith.constant 0 : i32
    %c0_i32_0 = arith.constant 0 : i32
    %c0_i32_1 = arith.constant 0 : i32
    return %c0_i32, %c0_i32_0 : i32, i32
  }
  func.func @transform_7(%arg0: i32) -> (i32, i32) {
    %c0_i32 = arith.constant 0 : i32
    %c0_i32_0 = arith.constant 0 : i32
    return %arg0, %c0_i32 : i32, i32
  }
}

</mosaic_0001>

<bundles_post_ra>
// kernel: tpu_custom_call.1
= control target key start
LH: loop header
LB: loop body
LE: loop exit
PB: predicated region body
PF: predicated region fallthrough
CT: control target
= control target key end

     0   :  { %12 = vsyncpa [#allocation3], 0  ;;  %s628_s0 = inlined_call_operand.hbm [shape: f32[8,8], index: 0, kind: input, shape index: {}]   ;;  %s629_s1 = inlined_call_operand.hbm [shape: f32[8,64], index: 1, kind: input, shape index: {}]   ;;  %s630_s2 = inlined_call_operand.vmem [shape: f32[1,64], index: 2, kind: input, shape index: {}]   ;;  %s631_s3 = inlined_call_operand.hbm [shape: f32[64,64], index: 3, kind: input, shape index: {}]   ;;  %s632_s4 = inlined_call_operand.vmem [shape: f32[1,64], index: 4, kind: input, shape index: {}]   ;;  %s633_s5 = inlined_call_operand.hbm [shape: f32[64,320], index: 5, kind: input, shape index: {}]   ;;  %s634_s6 = inlined_call_operand.vmem [shape: f32[1,320], index: 6, kind: input, shape index: {}]   ;;  %s635_s7 = inlined_call_operand.hbm [shape: f32[8,256], index: 7, kind: output, shape index: {}]  }
   0x1   :  { %13 = vsyncpa [#allocation6], 0 }
   0x2   :  { %14 = vsyncpa [#allocation9], 0  ;;  %s32_s26 = sshll.u32 %s629_s1, 4  ;;  %s33_s26 = int_to_ptr.hbm [resolvable:$true] %s32_s26 }
   0x3   :  { %15 = vsyncpa [#allocation4], 0  ;;  %s525_s27 = smov [#allocation5]   ;;  %s21_s8 = sshll.u32 %s628_s0, 4  ;;  %s22_s8 = int_to_ptr.hbm [resolvable:$true] %s21_s8 }
   0x4   :  { %s34_s28 = sshll.u32 %s525_s27, 4  ;;  %s526_s9 = smov [#allocation2]   ;;  %s35_s28 = int_to_ptr.vmem [resolvable:$true] %s34_s28 }
   0x5   :  { %37 = dma.hbm_to_vmem [thread:$0]  %s33_s26, 128, %s35_s28, [#allocation6]  }
   0x6   :  { %s23_s10 = sshll.u32 %s526_s9, 4  ;;  %s44_s13 = sshll.u32 %s631_s3, 4  ;;  %s24_s10 = int_to_ptr.vmem [resolvable:$true] %s23_s10  ;;  %s45_s13 = int_to_ptr.hbm [resolvable:$true] %s44_s13 }
   0x7   :  { %26 = dma.hbm_to_vmem [thread:$0]  %s22_s8, 128, %s24_s10, [#allocation3]  }
   0x8   :  { %s527_s1 = smov [#allocation7]   ;;  %s59_s17 = sshll.u32 %s633_s5, 4  ;;  %s60_s17 = int_to_ptr.hbm [resolvable:$true] %s59_s17 }
   0x9   :  { %s46_s14 = sshll.u32 %s527_s1, 4  ;;  %s528_s18 = smov 128   ;;  %s47_s14 = int_to_ptr.vmem [resolvable:$true] %s46_s14 }
   0xa   :  { %s529_s0 = smov 8   ;;  %s530_s19 = smov [#allocation8]  }
   0xb   :  { %52 = dma.hbm_to_vmem [thread:$0]  %s45_s13, 1024, %s47_s14, [#allocation6], %s528_s18, %s528_s18, %s529_s0  }
   0xc   :  { %s61_s20 = sshll.u32 %s530_s19, 4  ;;  %s531_s21 = smov 384   ;;  %s62_s20 = int_to_ptr.vmem [resolvable:$true] %s61_s20 }
   0xd   :  { %s532_s22 = smov 24  }
   0xe   :  { %67 = dma.hbm_to_vmem [thread:$0]  %s60_s17, 3072, %s62_s20, [#allocation9], %s531_s21, %s531_s21, %s532_s22  }
   0xf   :  { %517 = dma.done.wait [#allocation3], 128  }
  0x10   :  { %518 = vsyncadd [#allocation3], 4294967168 }
  0x11   :  { %519 = dma.done.wait [#allocation6], 1152  }
  0x12   :  { %520 = vsyncadd [#allocation6], 4294966144 }
  0x13   :  { %521 = dma.done.wait [#allocation9], 3072  }
  0x14   :  { %522 = vsyncadd [#allocation9], 4294964224  ;;  %vm92_vm0 = vcmask 64512   ;;  %v87_v0 = vld [vmem:[#allocation5] sm:$0xff]  ;;  %v86_v1 = vld [vmem:[#allocation2] sm:$0xff]  ;;  %vm129_vm1 = vcmask 523264  }
  0x15   :  { %v124_v2 = vld [vmem:[#allocation7 + $0x38] sm:$0xff]  ;;  %111 = vmatpush.msra.mxu0 %v87_v0  ;;  %v123_v3 = vld [vmem:[#allocation7 + $0x30] sm:$0xff]  ;;  %v122_v4 = vld [vmem:[#allocation7 + $0x28] sm:$0xff]  ;;  %s533_s26 = smov 64   ;;  %s356_s29 = sshll.u32 %s635_s7, 4  ;;  %s357_s29 = int_to_ptr.hbm [resolvable:$true] %s356_s29 }
  0x16   :  { %141 = vmatpush.msra.mxu1 %v124_v2  ;;  %368 = vmatmul.msk.f32.vlgmr.msra.gmra.mxu0 %vm92_vm0, %v86_v1  ;;  %v121_v5 = vld [vmem:[#allocation7 + $0x20] sm:$0xff]  ;;  %v120_v6 = vld [vmem:[#allocation7 + $0x18] sm:$0xff]  ;;  %v119_v7 = vld [vmem:[#allocation7 + $0x10] sm:$0xff] }
  0x17   :  { %v118_v8 = vld [vmem:[#allocation7 + $0x8] sm:$0xff]  ;;  %v117_v9 = vld [vmem:[#allocation7] sm:$0xff]  ;;  %v176_v11 = vld [vmem:[#allocation8 + $0xb0] sm:$0xff] }
  0x18   :  { %142 = vmatpush.msra.mxu1 %v123_v3  ;;  %v175_v10 = vld [vmem:[#allocation8 + $0xa8] sm:$0xff]  ;;  %v177_v12 = vld [vmem:[#allocation8 + $0xb8] sm:$0xff]  ;;  %217 = vmatpush.msra.mxu3 %v176_v11  ;;  %v172_v13 = vld [vmem:[#allocation8 + $0x90] sm:$0xff] }
  0x19   :  { %197 = vmatpush.msra.mxu2 %v175_v10  ;;  %v173_v14 = vld [vmem:[#allocation8 + $0x98] sm:$0xff]  ;;  %v174_v15 = vld [vmem:[#allocation8 + $0xa0] sm:$0xff]  ;;  %237 = vmatpush.msrb.mxu0 %v177_v12  ;;  %v171_v18 = vld [vmem:[#allocation8 + $0x88] sm:$0xff] }
  0x1a   :  { %143 = vmatpush.msra.mxu1 %v122_v4  ;;  %v169_v16 = vld [vmem:[#allocation8 + $0x78] sm:$0xff]  ;;  %v170_v17 = vld [vmem:[#allocation8 + $0x80] sm:$0xff]  ;;  %218 = vmatpush.msra.mxu3 %v173_v14  ;;  %v167_v20 = vld [vmem:[#allocation8 + $0x68] sm:$0xff] }
  0x1b   :  { %198 = vmatpush.msra.mxu2 %v172_v13  ;;  %238 = vmatpush.msrb.mxu0 %v174_v15  ;;  %v166_v19 = vld [vmem:[#allocation8 + $0x60] sm:$0xff]  ;;  %v168_v21 = vld [vmem:[#allocation8 + $0x70] sm:$0xff]  ;;  %v163_v22 = vld [vmem:[#allocation8 + $0x48] sm:$0xff] }
  0x1c   :  { %144 = vmatpush.msra.mxu1 %v121_v5  ;;  %219 = vmatpush.msra.mxu3 %v170_v17  ;;  %v164_v23 = vld [vmem:[#allocation8 + $0x50] sm:$0xff]  ;;  %v165_v24 = vld [vmem:[#allocation8 + $0x58] sm:$0xff]  ;;  %v162_v31 = vld [vmem:[#allocation8 + $0x40] sm:$0xff] }
  0x1d   :  { %199 = vmatpush.msra.mxu2 %v169_v16  ;;  %239 = vmatpush.msrb.mxu0 %v171_v18  ;;  %v383_v25 = vld [vmem:[%s630_s2] ss:$0 sm:$0xff]  ;;  %v161_v30 = vld [vmem:[#allocation8 + $0x38] sm:$0xff]  ;;  %v158_v33 = vld [vmem:[#allocation8 + $0x20] sm:$0xff] }
  0x1e   :  { %145 = vmatpush.msra.mxu1 %v120_v6  ;;  %220 = vmatpush.msra.mxu3 %v167_v20  ;;  %v160_v29 = vld [vmem:[#allocation8 + $0x30] sm:$0xff]  ;;  %v157_v32 = vld [vmem:[#allocation8 + $0x18] sm:$0xff]  ;;  %v159_v34 = vld [vmem:[#allocation8 + $0x28] sm:$0xff] }
  0x1f   :  { %200 = vmatpush.msra.mxu2 %v166_v19  ;;  %240 = vmatpush.msrb.mxu0 %v168_v21  ;;  %v154_v35 = vld [vmem:[#allocation8] sm:$0xff]  ;;  %v155_v36 = vld [vmem:[#allocation8 + $0x8] sm:$0xff]  ;;  %v156_v37 = vld [vmem:[#allocation8 + $0x10] sm:$0xff] }
  0x20   :  { %146 = vmatpush.msra.mxu1 %v119_v7  ;;  %221 = vmatpush.msra.mxu3 %v164_v23  ;;  %v384_v38 = vld [vmem:[%s632_s4] ss:$0 sm:$0xff]  ;;  %s534_s4 = smov [#allocation10]  }
  0x21   :  { %201 = vmatpush.msra.mxu2 %v163_v22  ;;  %241 = vmatpush.msrb.mxu0 %v165_v24  ;;  %v178_v42 = vld [vmem:[%s634_s6] sm:$0x7]  ;;  %s354_s6 = sshll.u32 %s534_s4, 4  ;;  %s355_s6 = int_to_ptr.vmem [resolvable:$true] %s354_s6 }
  0x22   :  { %147 = vmatpush.msra.mxu1 %v118_v8  ;;  %222 = vmatpush.msra.mxu3 %v161_v30  ;;  %v182_v43 = vperm.slane %v178_v42, 2  ;;  %v180_v46 = vperm.slane %v178_v42, 0  ;;  %v181_v47 = vperm.slane %v178_v42, 1 }
  0x23   :  { %202 = vmatpush.msra.mxu2 %v160_v29  ;;  %242 = vmatpush.msrb.mxu0 %v162_v31 }
  0x24   :  { %148 = vmatpush.msra.mxu1 %v117_v9  ;;  %223 = vmatpush.msra.mxu3 %v158_v33 }
  0x25   :  { %203 = vmatpush.msra.mxu2 %v157_v32  ;;  %243 = vmatpush.msrb.mxu0 %v159_v34 }
  0x26   :  { %224 = vmatpush.msra.mxu3 %v155_v36 }
  0x27   :  { %204 = vmatpush.msra.mxu2 %v154_v35  ;;  %244 = vmatpush.msrb.mxu0 %v156_v37 }
  0x93   :  { %v113_v26 = vpop.f32.mrf.mxu0 }
  0x94   :  { %v114_v27 = vadd.f32 %v383_v25, %v113_v26 }
  0x96   :  { %v116_v28 = vmax.f32 %v114_v27, 0.0 }
  0x98   :  { %369 = vmatmul.msk.f32.vlgmr.msra.gmra.mxu1 %vm129_vm1, %v116_v28 }
 0x115   :  { %v150_v39 = vpop.f32.mrf.mxu1 }
 0x116   :  { %v151_v40 = vadd.f32 %v384_v38, %v150_v39 }
 0x118   :  { %v153_v41 = vmax.f32 %v151_v40, 0.0 }
 0x11a   :  { %370 = vmatmul.msk.f32.vlgmr.msra.gmra.mxu2 %vm129_vm1, %v153_v41  ;;  %371 = vmatmul.msk.f32.vlgmr.msra.gmra.mxu3 %vm129_vm1, %v153_v41 }
 0x11b   :  { %372 = vmatmul.msk.f32.vlgmr.msrb.gmra.mxu0 %vm129_vm1, %v153_v41 }
 0x198   :  { %v246_v44 = vpop.f32.mrf.mxu0 }
 0x199   :  { %v247_v45 = vadd.f32 %v246_v44, %v182_v43 }
 0x19b   :  { %250 = vrot.lane.b32.xlu0 %v247_v45, %s533_s26 }
 0x19d   :  { %v206_v48 = vpop.f32.mrf.mxu2  ;;  %v226_v49 = vpop.f32.mrf.mxu3 }
 0x19e   :  { %v207_v50 = vadd.f32 %v206_v48, %v180_v46  ;;  %v227_v51 = vadd.f32 %v226_v49, %v181_v47 }
 0x20d   :  { %v251_v52 = vpop.permute.xlu0 %250 }
 0x20e   :  { %v253_v53 = vsel %vm129_vm1, %v247_v45, %v251_v52 }
 0x20f   :  { %v254_v54 = vadd.f32 %v253_v53, %v207_v50  ;;  %v255_v55 = vadd.f32 %v253_v53, %v227_v51 }
 0x211   :  { %v256_v56 = vmax.f32 %v254_v54, %v255_v55 }
 0x213   :  { %257 = vmax.xlane.f32.xlu0 %v256_v56 }
 0x286   :  { %v258_v57 = vpop.xlane.xlu0 %257 }
 0x287   :  { %v259_v58 = vsub.f32 %v254_v54, %v258_v57  ;;  %v260_v60 = vsub.f32 %v255_v55, %v258_v57 }
 0x289   :  { %v261_v59 = vmul.f32 1.442695, %v259_v58  ;;  %v263_v61 = vmul.f32 1.442695, %v260_v60 }
 0x28b   :  { %385 = vpow2.f32 %v261_v59 }
 0x28c   :  { %387 = vpow2.f32 %v263_v61 }
 0x291   :  { %v601_v62 = vpop.eup %385 }
 0x292   :  { %284 = vrot.lane.b32.xlu1 %v601_v62, %s533_s26  ;;  %v265_v63 = vsel %vm129_vm1, %v601_v62, 0.0  ;;  %v606_v0 = vpop.eup %387 }
 0x293   :  { %266 = vadd.xlane.f32.xlu2 %v265_v63  ;;  %v305_v1 = vsel %vm129_vm1, %v606_v0, 0.0 }
 0x29a   :  { %324 = vrot.lane.b32.xlu1 %v606_v0, %s533_s26 }
 0x2c4   :  { %306 = vadd.xlane.f32.xlu1 %v305_v1 }
 0x304   :  { %v285_v2 = vpop.permute.xlu1 %284 }
 0x305   :  { %v287_v3 = vsel %vm129_vm1, %v285_v2, 0.0 }
 0x306   :  { %288 = vadd.xlane.f32.xlu2 %v287_v3  ;;  %v267_v6 = vpop.xlane.xlu2 %266 }
 0x307   :  { %389 = vrcp.f32 %v267_v6  ;;  %v279_v20 = vand.u32 2147483648, %v267_v6  ;;  %vm273_vm3 = vweird.f32 %v267_v6  ;;  %v277_v21 = vand.u32 2147483647, %v267_v6 }
 0x309   :  { %v280_v28 = vor.u32 1.1754944e-38, %v279_v20  ;;  %vm278_vm6 = vcmp.eq.f32.partialorder %v277_v21, 8.507059e+37 }
 0x30c   :  { %v325_v4 = vpop.permute.xlu1 %324 }
 0x30d   :  { %v327_v5 = vsel %vm129_vm1, %v325_v4, 0.0  ;;  %v390_v8 = vpop.eup %389 }
 0x30e   :  { %328 = vadd.xlane.f32.xlu2 %v327_v5  ;;  %v269_v9 = vmul.f32 %v390_v8, %v267_v6  ;;  %vm274_vm2 = vweird.f32 %v390_v8 }
 0x30f   :  { %vm275_vm4 = vmor %vm273_vm3, %vm274_vm2 }
 0x310   :  { %v270_v11 = vsub.f32 1.0, %v269_v9 }
 0x312   :  { %v271_v14 = vmul.f32 %v390_v8, %v270_v11 }
 0x314   :  { %v272_v17 = vadd.f32 %v390_v8, %v271_v14 }
 0x316   :  { %v276_v25 = vsel %vm275_vm4, %v390_v8, %v272_v17 }
 0x317   :  { %v281_v31 = vsel %vm278_vm6, %v280_v28, %v276_v25 }
 0x318   :  { %v282_v41 = vmul.f32 %v601_v62, %v281_v31 }
 0x337   :  { %v307_v7 = vpop.xlane.xlu1 %306 }
 0x338   :  { %391 = vrcp.f32 %v307_v7  ;;  %vm313_vm11 = vweird.f32 %v307_v7  ;;  %v319_v36 = vand.u32 2147483648, %v307_v7  ;;  %v317_v39 = vand.u32 2147483647, %v307_v7 }
 0x33a   :  { %v320_v48 = vor.u32 1.1754944e-38, %v319_v36  ;;  %vm318_vm14 = vcmp.eq.f32.partialorder %v317_v39, 8.507059e+37 }
 0x33e   :  { %v392_v10 = vpop.eup %391 }
 0x33f   :  { %v309_v13 = vmul.f32 %v392_v10, %v307_v7  ;;  %vm314_vm8 = vweird.f32 %v392_v10 }
 0x340   :  { %vm613_vm12 = vmor %vm313_vm11, %vm314_vm8 }
 0x341   :  { %v310_v16 = vsub.f32 1.0, %v309_v13 }
 0x343   :  { %v311_v23 = vmul.f32 %v392_v10, %v310_v16 }
 0x345   :  { %v312_v32 = vadd.f32 %v392_v10, %v311_v23 }
 0x347   :  { %v316_v43 = vsel %vm613_vm12, %v392_v10, %v312_v32 }
 0x348   :  { %v321_v50 = vsel %vm318_vm14, %v320_v48, %v316_v43 }
 0x349   :  { %v322_v54 = vmul.f32 %v606_v0, %v321_v50 }
 0x379   :  { %v289_v12 = vpop.xlane.xlu2 %288 }
 0x37a   :  { %393 = vrcp.f32 %v289_v12  ;;  %v301_v24 = vand.u32 2147483648, %v289_v12  ;;  %v299_v27 = vand.u32 2147483647, %v289_v12  ;;  %vm295_vm7 = vweird.f32 %v289_v12 }
 0x37c   :  { %v302_v33 = vor.u32 1.1754944e-38, %v301_v24  ;;  %vm300_vm10 = vcmp.eq.f32.partialorder %v299_v27, 8.507059e+37 }
 0x380   :  { %v394_v15 = vpop.eup %393 }
 0x381   :  { %v291_v18 = vmul.f32 %v394_v15, %v289_v12  ;;  %v329_v19 = vpop.xlane.xlu2 %328  ;;  %vm296_vm5 = vweird.f32 %v394_v15 }
 0x382   :  { %395 = vrcp.f32 %v329_v19  ;;  %vm297_vm9 = vmor %vm295_vm7, %vm296_vm5  ;;  %v341_v44 = vand.u32 2147483648, %v329_v19  ;;  %v339_v46 = vand.u32 2147483647, %v329_v19  ;;  %vm335_vm15 = vweird.f32 %v329_v19 }
 0x383   :  { %v292_v22 = vsub.f32 1.0, %v291_v18 }
 0x384   :  { %v342_v51 = vor.u32 1.1754944e-38, %v341_v44  ;;  %vm340_vm2 = vcmp.eq.f32.partialorder %v339_v46, 8.507059e+37 }
 0x385   :  { %v293_v26 = vmul.f32 %v394_v15, %v292_v22 }
 0x387   :  { %v294_v29 = vadd.f32 %v394_v15, %v293_v26 }
 0x388   :  { %v396_v30 = vpop.eup %395 }
 0x389   :  { %v298_v34 = vsel %vm297_vm9, %v394_v15, %v294_v29  ;;  %v331_v35 = vmul.f32 %v396_v30, %v329_v19  ;;  %vm336_vm13 = vweird.f32 %v396_v30 }
 0x38a   :  { %v303_v37 = vsel %vm300_vm10, %v302_v33, %v298_v34  ;;  %vm337_vm0 = vmor %vm335_vm15, %vm336_vm13 }
 0x38b   :  { %v332_v40 = vsub.f32 1.0, %v331_v35  ;;  %v304_v42 = vmul.f32 %v601_v62, %v303_v37 }
 0x38d   :  { %v333_v45 = vmul.f32 %v396_v30, %v332_v40  ;;  %v345_v47 = vsel %vm129_vm1, %v282_v41, %v304_v42 }
 0x38e   :  { %347 = vst [vmem:[#allocation10] sm:$0xff] %v345_v47 }
 0x38f   :  { %v334_v49 = vadd.f32 %v396_v30, %v333_v45 }
 0x391   :  { %v338_v52 = vsel %vm337_vm0, %v396_v30, %v334_v49 }
 0x392   :  { %v343_v53 = vsel %vm340_vm2, %v342_v51, %v338_v52 }
 0x393   :  { %v344_v55 = vmul.f32 %v606_v0, %v343_v53 }
 0x395   :  { %v346_v56 = vsel %vm129_vm1, %v322_v54, %v344_v55 }
 0x396   :  { %348 = vst [vmem:[#allocation10 + $0x8] sm:$0xff] %v346_v56 }
 0x397   :  { %359 = dma.vmem_to_hbm [thread:$0]  %s355_s6, 256, %s357_s29, [#allocation4]  }
 0x398   :  { %523 = dma.done.wait [#allocation4], 256  }
 0x399   :  { %524 = vsyncadd [#allocation4], 4294967040 }
 0x39a   :  { %364 = vsyncpa [#allocation3], 1 }
 0x39b   :  { %365 = vsyncpa [#allocation6], 1 }
 0x39c   :  { %366 = vsyncpa [#allocation9], 1 }
 0x39d   :  { %367 = vsyncpa [#allocation4], 1 }

</bundles_post_ra>
